<compile_context>
chip_gen: v6e
topology: v6e:2x2x1
jax: 0.10.0
libtpu: 0.0.40
codegen_flags: <defaults>
</compile_context>

<pallas_src>
import functools

import jax
import jax.numpy as jnp
from jax import lax
from jax.experimental import pallas as pl
from jax.experimental.pallas import tpu as pltpu


def detect_kernel(x_ref, w1_ref, b1_ref, w2_ref, b2_ref, w3_ref, b3_ref,
                  out_ref, *, n_neigh):
    x = x_ref[...]                                   # (T, n_neigh*tb), lane-dense

    # temporal_filter1 (Conv2d [spike_size,1]) at output row H=0 -> one matmul.
    h1 = jnp.dot(w1_ref[...], x, preferred_element_type=jnp.float32)
    h1 = jnp.maximum(h1 + b1_ref[...], 0.0)          # (feat1, n_neigh*tb) f32

    # temporal_filter2 (1x1 Conv2d) -> second matmul (f32, tiny).
    h2 = jnp.dot(w2_ref[...], h1, preferred_element_type=jnp.float32)
    h2 = jnp.maximum(h2 + b2_ref[...], 0.0)          # (feat2, n_neigh*tb) f32

    # Linear(feat2*n_neigh, 1): fold the per-neighbor weight column into the
    # static segment-sum over the n_neigh lane groups (batch stays on lanes),
    # then a small cross-sublane reduce over feat2 rows.
    w3 = w3_ref[...]                                 # (feat2, n_neigh)
    tb = h2.shape[1] // n_neigh
    acc = h2[:, 0:tb] * w3[:, 0:1]
    for w in range(1, n_neigh):
        acc = acc + h2[:, w * tb:(w + 1) * tb] * w3[:, w:w + 1]   # (feat2, tb)
    logit = jnp.sum(acc, axis=0, keepdims=True) + b3_ref[...]     # (1, tb)
    prob = jax.nn.sigmoid(logit)

    # Write rows directly (no concatenated temporary).
    out_ref[0:1, :] = prob
    out_ref[1:2, :] = logit


def _round_up(x, m):
    return ((x + m - 1) // m) * m


def _detect_forward_impl(x, packed_params, *, tb=None, use_bf16=True):
    """x: (B, T, W) float32.  Returns (sigmoid(logit), logit), both (B, 1)."""
    w1_eff, b1, w2, b2, w3, b3 = packed_params
    B, T, W = x.shape
    feat1 = w1_eff.shape[0]
    feat2 = w2.shape[0]

    if tb is None:
        cap = 4096                                  # amortize ~0.35us/step overhead
        target = min(B, cap)
        if B > 256:
            # Keep >= 2 grid steps so the "parallel" grid axis can shard across
            # both TensorCores on v7x (no effect on single-TC v5e/v6e).
            target = min(target, _round_up(pl.cdiv(B, 2), 128))
        tb = _round_up(max(target, 1), 128)
    else:
        tb = _round_up(tb, 128)                     # lane-dense output, aligned slices
    nblk = pl.cdiv(B, tb)
    Bp = nblk * tb

    compute_dtype = jnp.bfloat16 if use_bf16 else jnp.float32

    # Layout plumbing (fuses with the jit): downcast + zero-pad + relayout
    # (Bp, T, W) -> (nblk, T, W*tb) with lane index j = w*tb + b_local.
    xc = x.astype(compute_dtype)
    if Bp != B:                                     # ragged batch: zero-pad
        xc = jnp.pad(xc, ((0, Bp - B), (0, 0), (0, 0)))
    x2 = (xc.reshape(nblk, tb, T, W)
            .transpose(0, 2, 3, 1)
            .reshape(nblk, T, W * tb))
    w1c = w1_eff.astype(compute_dtype)              # match x dtype -> native MXU

    kern = functools.partial(detect_kernel, n_neigh=W)

    itemsize = 2 if use_bf16 else 4
    flops = 2 * Bp * (feat1 * T * W + feat2 * feat1 * W + feat2 * W)
    bytes_accessed = (Bp * T * W * itemsize            # x2 read
                      + 2 * Bp * 4                     # (prob, logit) write
                      + feat1 * T * itemsize + feat2 * feat1 * 4
                      + feat2 * W * 4 + (feat1 + feat2 + 1) * 4)

    out = pl.pallas_call(
        kern,
        out_shape=jax.ShapeDtypeStruct((nblk, 2, tb), jnp.float32),
        grid_spec=pltpu.PrefetchScalarGridSpec(
            num_scalar_prefetch=0,
            grid=(nblk,),
            in_specs=[
                pl.BlockSpec((None, T, W * tb), lambda i: (i, 0, 0)),   # x2
                pl.BlockSpec((feat1, T), lambda i: (0, 0)),             # w1_eff
                pl.BlockSpec((feat1, 1), lambda i: (0, 0)),             # b1
                pl.BlockSpec((feat2, feat1), lambda i: (0, 0)),         # w2
                pl.BlockSpec((feat2, 1), lambda i: (0, 0)),             # b2
                pl.BlockSpec((feat2, W), lambda i: (0, 0)),             # w3 (tiny)
                pl.BlockSpec((1, 1), lambda i: (0, 0)),                 # b3
            ],
            out_specs=pl.BlockSpec((None, 2, tb), lambda i: (i, 0, 0)),
        ),
        compiler_params=pltpu.CompilerParams(
            dimension_semantics=("parallel",)),
        cost_estimate=pl.CostEstimate(
            flops=flops, transcendentals=Bp, bytes_accessed=bytes_accessed),
    )(x2, w1c, b1, w2, b2, w3, b3)

    flat = out.transpose(1, 0, 2).reshape(2, Bp)[:, :B]   # (2, B); drop padded rows
    prob = flat[0][:, None]
    logit = flat[1][:, None]
    return prob, logit


# jit the whole wrapper so pad/downcast/transpose fuse into one pass around the kernel.
detect_forward = jax.jit(_detect_forward_impl, static_argnames=("tb", "use_bf16"))


# ---------------- parameter setup (deterministic, synthetic) ----------------

def make_raw_params(key, n_filters, spike_size, n_neigh):
    """Shapes follow the PyTorch module's __init__."""
    feat1, feat2, _ = n_filters
    ks = jax.random.split(key, 6)
    w1_conv = 0.3 * jax.random.normal(ks[0], (feat1, 1, spike_size, 1), jnp.float32)
    b1 = 0.1 * jax.random.normal(ks[1], (feat1,), jnp.float32)
    w2_conv = 0.3 * jax.random.normal(ks[2], (feat2, feat1, 1, 1), jnp.float32)
    b2 = 0.1 * jax.random.normal(ks[3], (feat2,), jnp.float32)
    w_lin = 0.3 * jax.random.normal(ks[4], (1, feat2 * n_neigh), jnp.float32)
    b_lin = 0.1 * jax.random.normal(ks[5], (1,), jnp.float32)
    return (w1_conv, b1, w2_conv, b2, w_lin, b_lin)


def pack_params_for_kernel(raw, spike_size, T, n_neigh):
    """Glue: reshape PyTorch-layout weights into kernel-layout matrices."""
    w1_conv, b1, w2_conv, b2, w_lin, b_lin = raw
    feat1 = w1_conv.shape[0]
    feat2 = w2_conv.shape[0]
    pad = (spike_size - 1) // 2
    # Effective weights for conv output row H=0 with zero padding of `pad` rows.
    k_eff = min(T, spike_size - pad)
    w1_full = w1_conv[:, 0, :, 0]                          # (feat1, spike_size)
    w1_eff = jnp.zeros((feat1, T), jnp.float32)
    w1_eff = w1_eff.at[:, :k_eff].set(w1_full[:, pad:pad + k_eff])
    w2 = w2_conv[:, :, 0, 0]                               # (feat2, feat1)
    w3 = w_lin.reshape(feat2, n_neigh)                     # matches reshape(B, -1)
    return (w1_eff, b1[:, None], w2, b2[:, None], w3, b_lin[:, None])


# ---------------- pure-JAX reference (mirrors the PyTorch forward) ----------

def detect_forward_ref(x, raw, spike_size):
    w1_conv, b1, w2_conv, b2, w_lin, b_lin = raw
    pad = (spike_size - 1) // 2
    xin = x[:, None, :, :]                                 # NCHW
    h1 = lax.conv_general_dilated(
        xin, w1_conv, window_strides=(1, 1),
        padding=((pad, pad), (0, 0)),
        dimension_numbers=('NCHW', 'OIHW', 'NCHW'))
    h1 = jnp.maximum(h1 + b1[None, :, None, None], 0.0)
    h2 = lax.conv_general_dilated(
        h1, w2_conv, window_strides=(1, 1), padding=((0, 0), (0, 0)),
        dimension_numbers=('NCHW', 'OIHW', 'NCHW'))
    h2 = jnp.maximum(h2 + b2[None, :, None, None], 0.0)
    h2 = h2[:, :, 0, :]                                    # (B, feat2, W)
    flat = h2.reshape(h2.shape[0], -1)
    logit = flat @ w_lin.T + b_lin[None, :]
    return jax.nn.sigmoid(logit), logit


if __name__ == "__main__":
    B, T = 16, 7
    spike_size = 7
    n_filters = (8, 8, 4)          # feat3 is stored by the module but unused in forward
    n_chan, n_neigh = 10, 7        # channel_index shape (n_chan, n_neigh); only n_neigh matters
    _channel_index = jnp.tile(jnp.arange(n_neigh)[None, :], (n_chan, 1))  # synthetic

    key = jax.random.PRNGKey(0)
    kx, kp = jax.random.split(key)
    x = jax.random.normal(kx, (B, T, n_neigh), jnp.float32)

    raw = make_raw_params(kp, n_filters, spike_size, n_neigh)
    packed = pack_params_for_kernel(raw, spike_size, T, n_neigh)

    prob_ref, logit_ref = detect_forward_ref(x, raw, spike_size)

    # 1) exact-parity f32 path (tb rounds up to 128, grid=(1,))
    prob, logit = detect_forward(x, packed, use_bf16=False)
    jax.block_until_ready((prob, logit))
    assert prob.shape == (B, 1) and logit.shape == (B, 1)
    assert jnp.allclose(logit, logit_ref, atol=1e-4, rtol=1e-4)
    assert jnp.allclose(prob, prob_ref, atol=1e-5, rtol=1e-5)

    # 2) default bf16-MXU path (halved HBM stream); f32 accumulation -> loose parity
    prob_b, logit_b = detect_forward(x, packed)
    jax.block_until_ready((prob_b, logit_b))
    assert prob_b.shape == (B, 1) and logit_b.shape == (B, 1)
    assert jnp.allclose(logit_b, logit_ref, atol=5e-2, rtol=2e-2)
    assert jnp.allclose(prob_b, prob_ref, atol=2e-2)

    # 3) multi-block grid path (ragged batch, nblk > 1, replicated weight blocks)
    reps = 20
    xr = jnp.tile(x, (reps, 1, 1))                         # B=320 -> tb=128, nblk=3
    prob2, logit2 = detect_forward(xr, packed, tb=128, use_bf16=False)
    jax.block_until_ready((prob2, logit2))
    assert jnp.allclose(logit2, jnp.tile(logit_ref, (reps, 1)), atol=1e-4, rtol=1e-4)
    assert jnp.allclose(prob2, jnp.tile(prob_ref, (reps, 1)), atol=1e-5, rtol=1e-5)

    print("KERNEL_OK")
</pallas_src>

<mosaic_0001>
module attributes {stable_mosaic.version = 11 : i64} {
  func.func @detect_kernel(%arg0: i32, %arg1: memref<1x7x896xf32, #tpu.memory_space<vmem>>, %arg2: memref<8x7xf32, #tpu.memory_space<vmem>>, %arg3: memref<8x1xf32, #tpu.memory_space<vmem>>, %arg4: memref<8x8xf32, #tpu.memory_space<vmem>>, %arg5: memref<8x1xf32, #tpu.memory_space<vmem>>, %arg6: memref<8x7xf32, #tpu.memory_space<vmem>>, %arg7: memref<1x1xf32, #tpu.memory_space<vmem>>, %arg8: memref<1x2x128xf32, #tpu.memory_space<vmem>>) attributes {dimension_semantics = [#tpu.dimension_semantics<parallel>], iteration_bounds = array<i64: 1>, scalar_prefetch = 0 : i64, scratch_operands = 0 : i64, tpu.core_type = #tpu.core_type<tc>, window_params = [{transform_indices = @transform_0, window_bounds = array<i64: 1, 7, 896>}, {pipeline_mode = #tpu.pipeline_mode<synchronous>, transform_indices = @transform_1, window_bounds = array<i64: 8, 7>}, {pipeline_mode = #tpu.pipeline_mode<synchronous>, transform_indices = @transform_2, window_bounds = array<i64: 8, 1>}, {pipeline_mode = #tpu.pipeline_mode<synchronous>, transform_indices = @transform_3, window_bounds = array<i64: 8, 8>}, {pipeline_mode = #tpu.pipeline_mode<synchronous>, transform_indices = @transform_4, window_bounds = array<i64: 8, 1>}, {pipeline_mode = #tpu.pipeline_mode<synchronous>, transform_indices = @transform_5, window_bounds = array<i64: 8, 7>}, {pipeline_mode = #tpu.pipeline_mode<synchronous>, transform_indices = @transform_6, window_bounds = array<i64: 1, 1>}, {transform_indices = @transform_7, window_bounds = array<i64: 1, 2, 128>}]} {
    %c0 = arith.constant 0 : index
    %c0_0 = arith.constant 0 : index
    %c0_1 = arith.constant 0 : index
    %0 = vector.load %arg1[%c0, %c0_0, %c0_1] : memref<1x7x896xf32, #tpu.memory_space<vmem>>, vector<1x7x896xf32>
    %1 = vector.shape_cast %0 : vector<1x7x896xf32> to vector<7x896xf32>
    %c0_2 = arith.constant 0 : index
    %c0_3 = arith.constant 0 : index
    %2 = vector.load %arg2[%c0_2, %c0_3] : memref<8x7xf32, #tpu.memory_space<vmem>>, vector<8x7xf32>
    %cst = arith.constant dense<0.000000e+00> : vector<8x896xf32>
    %3 = tpu.matmul %2, %1, %cst {dimension_numbers = #tpu.dot_dimension_numbers<[1], [0], [0], [1], [0, 0, 1, 1], [], []>} : vector<8x7xf32>, vector<7x896xf32>, vector<8x896xf32> -> vector<8x896xf32>
    %c0_4 = arith.constant 0 : index
    %c0_5 = arith.constant 0 : index
    %4 = vector.load %arg3[%c0_4, %c0_5] : memref<8x1xf32, #tpu.memory_space<vmem>>, vector<8x1xf32>
    %5 = vector.broadcast %4 : vector<8x1xf32> to vector<8x896xf32>
    %6 = arith.addf %3, %5 : vector<8x896xf32>
    %cst_6 = arith.constant 0.000000e+00 : f32
    %7 = vector.broadcast %cst_6 : f32 to vector<8x896xf32>
    %8 = arith.maximumf %6, %7 : vector<8x896xf32>
    %c0_7 = arith.constant 0 : index
    %c0_8 = arith.constant 0 : index
    %9 = vector.load %arg4[%c0_7, %c0_8] : memref<8x8xf32, #tpu.memory_space<vmem>>, vector<8x8xf32>
    %cst_9 = arith.constant dense<0.000000e+00> : vector<8x896xf32>
    %10 = tpu.matmul %9, %8, %cst_9 {dimension_numbers = #tpu.dot_dimension_numbers<[1], [0], [0], [1], [0, 0, 1, 1], [], []>} : vector<8x8xf32>, vector<8x896xf32>, vector<8x896xf32> -> vector<8x896xf32>
    %c0_10 = arith.constant 0 : index
    %c0_11 = arith.constant 0 : index
    %11 = vector.load %arg5[%c0_10, %c0_11] : memref<8x1xf32, #tpu.memory_space<vmem>>, vector<8x1xf32>
    %12 = vector.broadcast %11 : vector<8x1xf32> to vector<8x896xf32>
    %13 = arith.addf %10, %12 : vector<8x896xf32>
    %cst_12 = arith.constant 0.000000e+00 : f32
    %14 = vector.broadcast %cst_12 : f32 to vector<8x896xf32>
    %15 = arith.maximumf %13, %14 : vector<8x896xf32>
    %c0_13 = arith.constant 0 : index
    %c0_14 = arith.constant 0 : index
    %16 = vector.load %arg6[%c0_13, %c0_14] : memref<8x7xf32, #tpu.memory_space<vmem>>, vector<8x7xf32>
    %17 = vector.extract_strided_slice %15 {offsets = [0, 0], sizes = [8, 128], strides = [1, 1]} : vector<8x896xf32> to vector<8x128xf32>
    %18 = vector.extract_strided_slice %16 {offsets = [0, 0], sizes = [8, 1], strides = [1, 1]} : vector<8x7xf32> to vector<8x1xf32>
    %19 = vector.broadcast %18 : vector<8x1xf32> to vector<8x128xf32>
    %20 = arith.mulf %17, %19 : vector<8x128xf32>
    %21 = vector.extract_strided_slice %15 {offsets = [0, 128], sizes = [8, 128], strides = [1, 1]} : vector<8x896xf32> to vector<8x128xf32>
    %22 = vector.extract_strided_slice %16 {offsets = [0, 1], sizes = [8, 1], strides = [1, 1]} : vector<8x7xf32> to vector<8x1xf32>
    %23 = vector.broadcast %22 : vector<8x1xf32> to vector<8x128xf32>
    %24 = arith.mulf %21, %23 : vector<8x128xf32>
    %25 = arith.addf %20, %24 : vector<8x128xf32>
    %26 = vector.extract_strided_slice %15 {offsets = [0, 256], sizes = [8, 128], strides = [1, 1]} : vector<8x896xf32> to vector<8x128xf32>
    %27 = vector.extract_strided_slice %16 {offsets = [0, 2], sizes = [8, 1], strides = [1, 1]} : vector<8x7xf32> to vector<8x1xf32>
    %28 = vector.broadcast %27 : vector<8x1xf32> to vector<8x128xf32>
    %29 = arith.mulf %26, %28 : vector<8x128xf32>
    %30 = arith.addf %25, %29 : vector<8x128xf32>
    %31 = vector.extract_strided_slice %15 {offsets = [0, 384], sizes = [8, 128], strides = [1, 1]} : vector<8x896xf32> to vector<8x128xf32>
    %32 = vector.extract_strided_slice %16 {offsets = [0, 3], sizes = [8, 1], strides = [1, 1]} : vector<8x7xf32> to vector<8x1xf32>
    %33 = vector.broadcast %32 : vector<8x1xf32> to vector<8x128xf32>
    %34 = arith.mulf %31, %33 : vector<8x128xf32>
    %35 = arith.addf %30, %34 : vector<8x128xf32>
    %36 = vector.extract_strided_slice %15 {offsets = [0, 512], sizes = [8, 128], strides = [1, 1]} : vector<8x896xf32> to vector<8x128xf32>
    %37 = vector.extract_strided_slice %16 {offsets = [0, 4], sizes = [8, 1], strides = [1, 1]} : vector<8x7xf32> to vector<8x1xf32>
    %38 = vector.broadcast %37 : vector<8x1xf32> to vector<8x128xf32>
    %39 = arith.mulf %36, %38 : vector<8x128xf32>
    %40 = arith.addf %35, %39 : vector<8x128xf32>
    %41 = vector.extract_strided_slice %15 {offsets = [0, 640], sizes = [8, 128], strides = [1, 1]} : vector<8x896xf32> to vector<8x128xf32>
    %42 = vector.extract_strided_slice %16 {offsets = [0, 5], sizes = [8, 1], strides = [1, 1]} : vector<8x7xf32> to vector<8x1xf32>
    %43 = vector.broadcast %42 : vector<8x1xf32> to vector<8x128xf32>
    %44 = arith.mulf %41, %43 : vector<8x128xf32>
    %45 = arith.addf %40, %44 : vector<8x128xf32>
    %46 = vector.extract_strided_slice %15 {offsets = [0, 768], sizes = [8, 128], strides = [1, 1]} : vector<8x896xf32> to vector<8x128xf32>
    %47 = vector.extract_strided_slice %16 {offsets = [0, 6], sizes = [8, 1], strides = [1, 1]} : vector<8x7xf32> to vector<8x1xf32>
    %48 = vector.broadcast %47 : vector<8x1xf32> to vector<8x128xf32>
    %49 = arith.mulf %46, %48 : vector<8x128xf32>
    %50 = arith.addf %45, %49 : vector<8x128xf32>
    %cst_15 = arith.constant dense<0.000000e+00> : vector<128xf32>
    %51 = vector.multi_reduction <add>, %50, %cst_15 [0] : vector<8x128xf32> to vector<128xf32>
    %52 = vector.shape_cast %51 : vector<128xf32> to vector<1x128xf32>
    %c0_16 = arith.constant 0 : index
    %c0_17 = arith.constant 0 : index
    %53 = vector.load %arg7[%c0_16, %c0_17] : memref<1x1xf32, #tpu.memory_space<vmem>>, vector<1x1xf32>
    %54 = vector.broadcast %53 : vector<1x1xf32> to vector<1x128xf32>
    %55 = arith.addf %52, %54 : vector<1x128xf32>
    %56 = arith.negf %55 : vector<1x128xf32>
    %57 = math.exp %56 : vector<1x128xf32>
    %cst_18 = arith.constant 1.000000e+00 : f32
    %58 = vector.broadcast %cst_18 : f32 to vector<1x128xf32>
    %59 = arith.addf %58, %57 : vector<1x128xf32>
    %60 = arith.divf %58, %59 : vector<1x128xf32>
    %c0_19 = arith.constant 0 : index
    %c0_20 = arith.constant 0 : index
    %c0_21 = arith.constant 0 : index
    %61 = vector.load %arg8[%c0_19, %c0_20, %c0_21] : memref<1x2x128xf32, #tpu.memory_space<vmem>>, vector<1x1x128xf32>
    %62 = vector.shape_cast %61 : vector<1x1x128xf32> to vector<1x128xf32>
    %63 = vector.shape_cast %60 : vector<1x128xf32> to vector<1x1x128xf32>
    tpu.vector_store %arg8[%c0_19, %c0_20, %c0_21], %63 {strides = array<i32>} : memref<1x2x128xf32, #tpu.memory_space<vmem>>, vector<1x1x128xf32>,
    %c0_22 = arith.constant 0 : index
    %c1 = arith.constant 1 : index
    %c0_23 = arith.constant 0 : index
    %64 = vector.load %arg8[%c0_22, %c1, %c0_23] : memref<1x2x128xf32, #tpu.memory_space<vmem>>, vector<1x1x128xf32>
    %65 = vector.shape_cast %64 : vector<1x1x128xf32> to vector<1x128xf32>
    %66 = vector.shape_cast %55 : vector<1x128xf32> to vector<1x1x128xf32>
    tpu.vector_store %arg8[%c0_22, %c1, %c0_23], %66 {strides = array<i32>} : memref<1x2x128xf32, #tpu.memory_space<vmem>>, vector<1x1x128xf32>,
    return
  }
  func.func @transform_0(%arg0: i32) -> (i32, i32, i32) {
    %c0_i32 = arith.constant 0 : i32
    %c0_i32_0 = arith.constant 0 : i32
    %c0_i32_1 = arith.constant 0 : i32
    return %arg0, %c0_i32, %c0_i32_0 : i32, i32, i32
  }
  func.func @transform_1(%arg0: i32) -> (i32, i32) {
    %c0_i32 = arith.constant 0 : i32
    %c0_i32_0 = arith.constant 0 : i32
    %c0_i32_1 = arith.constant 0 : i32
    return %c0_i32, %c0_i32_0 : i32, i32
  }
  func.func @transform_2(%arg0: i32) -> (i32, i32) {
    %c0_i32 = arith.constant 0 : i32
    %c0_i32_0 = arith.constant 0 : i32
    %c0_i32_1 = arith.constant 0 : i32
    return %c0_i32, %c0_i32_0 : i32, i32
  }
  func.func @transform_3(%arg0: i32) -> (i32, i32) {
    %c0_i32 = arith.constant 0 : i32
    %c0_i32_0 = arith.constant 0 : i32
    %c0_i32_1 = arith.constant 0 : i32
    return %c0_i32, %c0_i32_0 : i32, i32
  }
  func.func @transform_4(%arg0: i32) -> (i32, i32) {
    %c0_i32 = arith.constant 0 : i32
    %c0_i32_0 = arith.constant 0 : i32
    %c0_i32_1 = arith.constant 0 : i32
    return %c0_i32, %c0_i32_0 : i32, i32
  }
  func.func @transform_5(%arg0: i32) -> (i32, i32) {
    %c0_i32 = arith.constant 0 : i32
    %c0_i32_0 = arith.constant 0 : i32
    %c0_i32_1 = arith.constant 0 : i32
    return %c0_i32, %c0_i32_0 : i32, i32
  }
  func.func @transform_6(%arg0: i32) -> (i32, i32) {
    %c0_i32 = arith.constant 0 : i32
    %c0_i32_0 = arith.constant 0 : i32
    %c0_i32_1 = arith.constant 0 : i32
    return %c0_i32, %c0_i32_0 : i32, i32
  }
  func.func @transform_7(%arg0: i32) -> (i32, i32, i32) {
    %c0_i32 = arith.constant 0 : i32
    %c0_i32_0 = arith.constant 0 : i32
    %c0_i32_1 = arith.constant 0 : i32
    return %arg0, %c0_i32, %c0_i32_0 : i32, i32, i32
  }
}

</mosaic_0001>

<bundles_post_ra>
// kernel: _detect_forward_impl.1
= control target key start
LH: loop header
LB: loop body
LE: loop exit
PB: predicated region body
PF: predicated region fallthrough
CT: control target
= control target key end

     0   :  { %vm46_vm0 = vcmask 1046528   ;;  %vm42_vm1 = vcmask 56320   ;;  %v784_v3 = vmov 0.0   ;;  %vm785_vm2 = vmmov 0   ;;  %s905_s0 = inlined_call_operand.vmem [shape: f32[1,7,896], index: 0, kind: input, shape index: {}]   ;;  %s906_s1 = inlined_call_operand.vmem [shape: f32[8,7], index: 1, kind: input, shape index: {}]   ;;  %s907_s2 = inlined_call_operand.vmem [shape: f32[8,1], index: 2, kind: input, shape index: {}]   ;;  %s908_s4 = inlined_call_operand.vmem [shape: f32[8,1], index: 4, kind: input, shape index: {}]   ;;  %s909_s5 = inlined_call_operand.vmem [shape: f32[8,7], index: 5, kind: input, shape index: {}]   ;;  %s910_s6 = inlined_call_operand.<no memory space> [shape: f32[1,1], index: 6, kind: input, shape index: {}]   ;;  %s911_s3 = inlined_call_operand.vmem [shape: f32[8,8], index: 3, kind: input, shape index: {}]   ;;  %s912_s7 = inlined_call_operand.vmem [shape: f32[1,2,128], index: 7, kind: output, shape index: {}]  }
   0x1   :  { %v29_v0 = vld [vmem:[%s905_s0 + $0x8] sm:$0x7f]  ;;  %v31_v1 = vld [vmem:[%s905_s0 + $0x18] sm:$0x7f]  ;;  %v28_v2 = vld [vmem:[%s905_s0] sm:$0x7f]  ;;  %132 = vmatprep.mubr.f32.mxu0 %v784_v3  ;;  %203 = vmatprep.mubr.f32.mxu1 %v784_v3  ;;  %v12_v14 = vstv %s910_s6 }
   0x2   :  { %731 = vmatprep.subr.msk.mxu0 %vm46_vm0, %v29_v0  ;;  %734 = vmatprep.subr.msk.mxu1 %vm46_vm0, %v31_v1  ;;  %v30_v4 = vld [vmem:[%s905_s0 + $0x10] sm:$0x7f]  ;;  %v35_v5 = vld [vmem:[%s906_s1] sm:$0xff]  ;;  %v33_v6 = vld [vmem:[%s905_s0 + $0x28] sm:$0x7f]  ;;  %v786_v10 = vmov 0  }
   0x3   :  { %732 = vmatpush1.msk.msra.mxu0 %vm46_vm0, %v28_v2  ;;  %735 = vmatpush1.msk.msra.mxu1 %vm46_vm0, %v30_v4  ;;  %v32_v7 = vld [vmem:[%s905_s0 + $0x20] sm:$0x7f]  ;;  %v34_v8 = vld [vmem:[%s905_s0 + $0x30] sm:$0x7f]  ;;  %v787_v13 = vmov 2   ;;  %v788_v15 = vmov 1  }
   0x4   :  { %733 = vmatmul.mubr.msk.f32.vlgmr.msra.gmra.mxu0 %vm42_vm1, %v35_v5  ;;  %736 = vmatmul.mubr.msk.f32.vlgmr.msra.gmra.mxu1 %vm42_vm1, %v35_v5  ;;  %v36_v9 = vld [vmem:[%s907_s2] sm:$0xff]  ;;  %13 = vst [vmem:[#allocation2] sm:$0x1] %v12_v14  ;;  %v789_v16 = vmov 5   ;;  %v790_v17 = vmov 3   ;;  %v791_v18 = vmov 4  }
   0x5   :  { %737 = vmatprep.subr.msk.mxu0 %vm46_vm0, %v33_v6  ;;  %751 = vmatprep.subr.mxu1 %v784_v3  ;;  %v359_v11 = vld [vmem:[%s908_s4] sm:$0xff]  ;;  %v792_v19 = vmov 6   ;;  %vm365_vm3 = vcmask 64512  }
   0x6   :  { %738 = vmatpush1.msk.msra.mxu0 %vm46_vm0, %v32_v7  ;;  %274 = vmatprep.mubr.f32.mxu0 %v784_v3  ;;  %v659_v12 = vld [vmem:[%s909_s5] sm:$0xff] }
   0x7   :  { %752 = vmatpush3.msk.msra.mxu1 %vm46_vm0, %v34_v8  ;;  %753 = vmatprep.mubr.msk.f32.mxu1 %vm785_vm2, %v784_v3  ;;  %v358_v39 = vld [vmem:[%s911_s3] sm:$0xff] }
   0x8   :  { %739 = vmatmul.mubr.msk.f32.vlgmr.msra.gmra.mxu0 %vm42_vm1, %v35_v5  ;;  %754 = vmatmul.mubr.msk.f32.vlgmr.msra.gmra.mxu1 %vm42_vm1, %v35_v5 }
   0x9   :  { %770 = vset.pattern.permute.xlu0 %v786_v10  ;;  %433 = vmatprep.mubr.f32.mxu0 %v784_v3 }
   0xa   :  { %39 = vperm.xlu0 %770, %v36_v9   ;;  %504 = vmatprep.mubr.f32.mxu1 %v784_v3 }
   0xb   :  { %771 = vset.pattern.permute.xlu1 %v786_v10  ;;  %v708_v20 = vld [vmem:[#allocation2] sm:$0x1] }
   0xc   :  { %662 = vperm.xlu1 %771, %v659_v12  }
   0xe   :  { %362 = vperm.xlu0 %770, %v359_v11  }
  0x10   :  { %772 = vset.pattern.permute.xlu1 %v788_v15 }
  0x11   :  { %667 = vperm.xlu1 %772, %v659_v12  }
  0x12   :  { %773 = vset.pattern.permute.xlu0 %v787_v13 }
  0x13   :  { %673 = vperm.xlu0 %773, %v659_v12  }
  0x15   :  { %774 = vset.pattern.permute.xlu1 %v790_v17 }
  0x16   :  { %679 = vperm.xlu1 %774, %v659_v12  }
  0x17   :  { %776 = vset.pattern.permute.xlu0 %v789_v16 }
  0x18   :  { %691 = vperm.xlu0 %776, %v659_v12  }
  0x1a   :  { %775 = vset.pattern.permute.xlu1 %v791_v18 }
  0x1b   :  { %685 = vperm.xlu1 %775, %v659_v12  }
  0x1c   :  { %779 = vset.pattern.permute.xlu0 %v786_v10 }
  0x1f   :  { %777 = vset.pattern.permute.xlu1 %v792_v19 }
  0x20   :  { %697 = vperm.xlu1 %777, %v659_v12  }
  0x24   :  { %778 = vset.pattern.permute.xlu1 %v786_v10 }
  0x25   :  { %711 = vperm.xlu1 %778, %v708_v20  }
  0x85   :  { %v40_v21 = vpop.permute.xlu0 %39 }
  0x87   :  { %v663_v45 = vpop.permute.xlu1 %662 }
  0x89   :  { %v363_v47 = vpop.permute.xlu0 %362 }
  0x8c   :  { %v668_v46 = vpop.permute.xlu1 %667 }
  0x8e   :  { %v674_v62 = vpop.permute.xlu0 %673 }
  0x91   :  { %v680_v50 = vpop.permute.xlu1 %679 }
  0x93   :  { %v692_v14 = vpop.permute.xlu0 %691 }
  0x96   :  { %v686_v6 = vpop.permute.xlu1 %685 }
  0x9b   :  { %v698_v18 = vpop.permute.xlu1 %697 }
  0xc4   :  { %v134_v22 = vpop.f32.mrf.mxu0  ;;  %v205_v23 = vpop.f32.mrf.mxu1 }
  0xc5   :  { %v206_v24 = vadd.f32 %v205_v23, %v40_v21  ;;  %v135_v25 = vadd.f32 %v134_v22, %v40_v21  ;;  %v714_v23 = vlaneseq }
  0xc6   :  { %v136_v26 = vpop.f32.mrf.mxu0  ;;  %v207_v27 = vpop.f32.mrf.mxu1 }
  0xc7   :  { %v137_v28 = vadd.f32 %v136_v26, %v40_v21  ;;  %v208_v29 = vadd.f32 %v207_v27, %v40_v21  ;;  %v353_v30 = vmax.f32 %v206_v24, 0.0  ;;  %v351_v36 = vmax.f32 %v135_v25, 0.0 }
  0xc8   :  { %v276_v31 = vpop.f32.mrf.mxu0  ;;  %v347_v32 = vpop.f32.mrf.mxu1  ;;  %v715_v26 = vshrl.u32 %v714_v23, 7 }
  0xc9   :  { %v352_v33 = vmax.f32 %v137_v28, 0.0  ;;  %v354_v34 = vmax.f32 %v208_v29, 0.0  ;;  %v348_v35 = vadd.f32 %v347_v32, %v40_v21  ;;  %v277_v37 = vadd.f32 %v276_v31, %v40_v21 }
  0xca   :  { %v278_v38 = vpop.f32.mrf.mxu0  ;;  %v755_v40 = vpop.f32.mrf.mxu1  ;;  %v716_v28 = vsub.s32 0, %v715_v26 }
  0xcb   :  { %v357_v41 = vmax.f32 %v348_v35, 0.0  ;;  %v279_v42 = vadd.f32 %v278_v38, %v40_v21  ;;  %399 = vmatprep.subr.mxu0 %v352_v33  ;;  %470 = vmatprep.subr.mxu1 %v354_v34  ;;  %v355_v44 = vmax.f32 %v277_v37, 0.0 }
  0xcc   :  { %400 = vmatpush1.msra.mxu0 %v351_v36  ;;  %471 = vmatpush1.msra.mxu1 %v353_v30  ;;  %v712_v30 = vpop.permute.xlu1 %711 }
  0xcd   :  { %v356_v43 = vmax.f32 %v279_v42, 0.0  ;;  %742 = vmatmul.mubr.msk.f32.vlgmr.msra.gmra.mxu0 %vm365_vm3, %v358_v39  ;;  %743 = vmatmul.mubr.msk.f32.vlgmr.msra.gmra.mxu1 %vm365_vm3, %v358_v39  ;;  %v717_v33 = vrot.slane %v712_v30, %v716_v28 }
  0xce   :  { %756 = vmatprep.subr.mxu1 %v784_v3  ;;  %575 = vmatprep.mubr.f32.mxu0 %v784_v3 }
  0xcf   :  { %757 = vmatpush3.msra.mxu1 %v357_v41  ;;  %541 = vmatprep.subr.mxu0 %v356_v43 }
  0xd0   :  { %542 = vmatpush1.msra.mxu0 %v355_v44  ;;  %758 = vmatprep.mubr.msk.f32.mxu1 %vm785_vm2, %v784_v3 }
  0xd1   :  { %744 = vmatmul.mubr.msk.f32.vlgmr.msra.gmra.mxu0 %vm365_vm3, %v358_v39  ;;  %759 = vmatmul.mubr.msk.f32.vlgmr.msra.gmra.mxu1 %vm365_vm3, %v358_v39 }
 0x18d   :  { %v435_v48 = vpop.f32.mrf.mxu0  ;;  %v506_v49 = vpop.f32.mrf.mxu1 }
 0x18e   :  { %v436_v51 = vadd.f32 %v435_v48, %v363_v47  ;;  %v507_v52 = vadd.f32 %v506_v49, %v363_v47 }
 0x18f   :  { %v437_v53 = vpop.f32.mrf.mxu0  ;;  %v508_v54 = vpop.f32.mrf.mxu1 }
 0x190   :  { %v652_v55 = vmax.f32 %v436_v51, 0.0  ;;  %v438_v56 = vadd.f32 %v437_v53, %v363_v47  ;;  %v509_v57 = vadd.f32 %v508_v54, %v363_v47  ;;  %v654_v60 = vmax.f32 %v507_v52, 0.0 }
 0x191   :  { %v577_v58 = vpop.f32.mrf.mxu0  ;;  %v648_v59 = vpop.f32.mrf.mxu1 }
 0x192   :  { %v653_v61 = vmax.f32 %v438_v56, 0.0  ;;  %v578_v63 = vadd.f32 %v577_v58, %v363_v47  ;;  %v665_v2 = vmul.f32 %v663_v45, %v652_v55  ;;  %v655_v4 = vmax.f32 %v509_v57, 0.0 }
 0x193   :  { %v579_v0 = vpop.f32.mrf.mxu0  ;;  %v760_v1 = vpop.f32.mrf.mxu1  ;;  %v676_v8 = vmul.f32 %v674_v62, %v654_v60  ;;  %v649_v10 = vadd.f32 %v648_v59, %v363_v47 }
 0x194   :  { %v670_v3 = vmul.f32 %v668_v46, %v653_v61  ;;  %v580_v5 = vadd.f32 %v579_v0, %v363_v47  ;;  %v656_v9 = vmax.f32 %v578_v63, 0.0  ;;  %v682_v11 = vmul.f32 %v680_v50, %v655_v4 }
 0x195   :  { %v658_v17 = vmax.f32 %v649_v10, 0.0 }
 0x196   :  { %v671_v7 = vadd.f32 %v670_v3, %v665_v2  ;;  %v657_v13 = vmax.f32 %v580_v5, 0.0  ;;  %v688_v16 = vmul.f32 %v686_v6, %v656_v9 }
 0x197   :  { %v700_v21 = vmul.f32 %v698_v18, %v658_v17 }
 0x198   :  { %v677_v12 = vadd.f32 %v676_v8, %v671_v7  ;;  %v694_v20 = vmul.f32 %v692_v14, %v657_v13 }
 0x19a   :  { %v683_v15 = vadd.f32 %v682_v11, %v677_v12 }
 0x19c   :  { %v689_v19 = vadd.f32 %v688_v16, %v683_v15 }
 0x19e   :  { %v695_v22 = vadd.f32 %v694_v20, %v689_v19 }
 0x1a0   :  { %v701_v24 = vadd.f32 %v700_v21, %v695_v22 }
 0x1a2   :  { %v702_v25 = vrot.slane %v701_v24, 4 }
 0x1a4   :  { %v703_v27 = vadd.f32 %v702_v25, %v701_v24 }
 0x1a6   :  { %v704_v29 = vrot.slane %v703_v27, 2 }
 0x1a8   :  { %v705_v31 = vadd.f32 %v704_v29, %v703_v27 }
 0x1aa   :  { %v706_v32 = vrot.slane %v705_v31, 1 }
 0x1ac   :  { %v707_v34 = vadd.f32 %v706_v32, %v705_v31 }
 0x1ae   :  { %v718_v35 = vadd.f32 %v717_v33, %v707_v34 }
 0x1b0   :  { %v746_v36 = vmul.f32 -1.442695, %v718_v35  ;;  %726 = vst [vmem:[%s912_s7 + $0x1] sm:$0x1] %v718_v35 }
 0x1b2   :  { %780 = vpow2.f32 %v746_v36 }
 0x1bf   :  { %v781_v37 = vpop.eup %780 }
 0x1c0   :  { %v722_v38 = vadd.f32 1.0, %v781_v37 }
 0x1c2   :  { %782 = vrcp.f32 %v722_v38 }
 0x1cf   :  { %v783_v39 = vpop.eup %782 }
 0x1d0   :  { %725 = vst [vmem:[%s912_s7] sm:$0x1] %v783_v39 }

</bundles_post_ra>
